<compile_context>
chip_gen: v7x
topology: tpu7x:2x2x1
jax: 0.10.0
libtpu: 0.0.40
codegen_flags: <defaults>
</compile_context>

<pallas_src>
import math

import jax
import jax.numpy as jnp
from jax.experimental import pallas as pl
from jax.experimental.pallas import tpu as pltpu


# ----------------------------------------------------------------------------
# Parameter-only glue: reproduces the torch index / gate math exactly.
# ----------------------------------------------------------------------------
def to_decard_idx(angle, size):
    """Angular -> Cartesian grid coordinate, exactly as in the torch module."""
    a = jnp.arcsin(jnp.sin(angle))
    b = jnp.cos(angle)
    c = (1.0 - jnp.sin(angle) ** 2 + 1e-06) ** 0.5
    f = a * b / c
    f = 2.0 * f / jnp.pi
    f = f + 1.0
    f = f / 2.0
    f = f * (size - 1)
    return f


def _edges_1d(weight, coord, pointed_size, ww):
    """Edge list of one 1-D synapse layer.

    weight, coord : (S, A) live on the "anchor" grid (A cells); coord points into a grid
    of `pointed_size` cells.  Returns flat (anchor_idx, pointed_idx, coef) over all
    synapses x anchors x window displacements.  In the 1-D FlatMorphicNetwork config the
    original code's leaked-`dim` gate quirk is a no-op (single axis), so the gate below is
    bug-for-bug identical to the torch math.
    """
    S, A = weight.shape
    P = int(pointed_size)
    deltas = jnp.arange(-ww, ww + 1, dtype=jnp.float32)                 # (D,)

    ang = coord[..., None] + jnp.pi * deltas / (P - 1)                  # (S, A, D)
    r = jnp.round(to_decard_idx(ang, P)).astype(jnp.int32)
    r = jnp.clip(r, 0, P - 1)                                           # defensive clip

    dec = to_decard_idx(coord, P)[..., None]                            # (S, A, 1)
    dist = jnp.sqrt((r.astype(jnp.float32) - dec) ** 2)
    gate = 1.0 / (1.0 + jnp.exp(-(6.0 * (ww - 2.0 * dist) / ww)))

    coef = weight[..., None] * gate                                     # (S, A, D)
    anchor = jnp.broadcast_to(
        jnp.arange(A, dtype=jnp.int32)[None, :, None], coef.shape)
    return (anchor.reshape(-1), r.reshape(-1),
            coef.reshape(-1).astype(jnp.float32))


def morphic_transfer_matrix(key, nin, nout, num_sinapse, ww):
    """Dense transfer matrix of one Flat_Morphic_module: out = x @ T.

    Axon_layer:     weights/coords on the input grid, coords point into the output grid,
                    scatter-add  (input anchor -> pointed output).
    Dendrite_layer: weights/coords on the output grid, coords point into the input grid,
                    gather       (pointed input -> output anchor).
    Both are linear in the signal, so DL(x) + AL(x) is one matrix.
    """
    S = num_sinapse
    k_aw, k_ac, k_dw, k_dc = jax.random.split(key, 4)

    w_a = jax.random.uniform(k_aw, (S, nin), jnp.float32, -1.0, 1.0)
    c_a = jax.random.uniform(k_ac, (S, nin), jnp.float32, 0.0, jnp.pi)
    a_anchor, a_pointed, a_coef = _edges_1d(w_a, c_a, nout, ww)

    w_d = jax.random.uniform(k_dw, (S, nout), jnp.float32, -1.0, 1.0)
    c_d = jax.random.uniform(k_dc, (S, nout), jnp.float32, 0.0, jnp.pi)
    d_anchor, d_pointed, d_coef = _edges_1d(w_d, c_d, nin, ww)

    T = jnp.zeros((nin, nout), jnp.float32)
    T = T.at[a_anchor, a_pointed].add(a_coef)    # Axon:     in-anchor  -> out-pointed
    T = T.at[d_pointed, d_anchor].add(d_coef)    # Dendrite: in-pointed -> out-anchor
    return T


def _round_up(x, m):
    return ((x + m - 1) // m) * m


def init_flat_morphic_network(key, input_size, num_classes, num_sinapse,
                              window_width, num_layers, num_future):
    """Deterministic parameter init (matching the module __init__ shapes) plus the
    precomputed, lane-dense-padded bf16 transfer matrices for the kernel."""
    nin = 1
    for s in input_size:
        nin *= int(s)
    F, C, L = num_future, num_classes, num_layers

    keys = jax.random.split(key, L + 2)
    T0 = morphic_transfer_matrix(keys[0], nin, F, num_sinapse, window_width)
    if L > 0:
        Th = jnp.stack([
            morphic_transfer_matrix(keys[1 + l], F, F, num_sinapse, window_width)
            for l in range(L)])                                      # (L, F, F)
    else:
        Th = jnp.zeros((0, F, F), jnp.float32)

    k_w, k_b = jax.random.split(keys[L + 1])
    bound = 1.0 / math.sqrt(F)                                       # nn.Linear-style
    Wout = jax.random.uniform(k_w, (F, C), jnp.float32, -bound, bound)
    bout = jax.random.uniform(k_b, (C,), jnp.float32, -bound, bound)

    bn_gamma = jnp.ones((L + 1,), jnp.float32)    # BatchNorm1d affine init (weight=1)
    bn_beta = jnp.zeros((L + 1,), jnp.float32)    # (bias=0)

    # Padded, lane-dense, bf16 copies for the kernel (parameter-only work, hoisted out of
    # the hot path).  Zero padding keeps padded rows/cols of every fresh pre-activation
    # exactly zero, which is what makes the kernel's full-slab BN sums equal the
    # valid-region sums.  bf16 operands ~2-3x MXU throughput + half the weight DMA/VMEM.
    nin_p, F_p, C_p = _round_up(nin, 128), _round_up(F, 128), _round_up(C, 128)
    T0_bf = jnp.zeros((nin_p, F_p), jnp.bfloat16).at[:nin, :F].set(T0.astype(jnp.bfloat16))
    L_blk = max(L, 1)                              # >=1 block so the Th BlockSpec is valid at L==0
    Th_bf = jnp.zeros((L_blk, F_p, F_p), jnp.bfloat16)
    if L > 0:
        Th_bf = Th_bf.at[:L, :F, :F].set(Th.astype(jnp.bfloat16))
    Wout_bf = jnp.zeros((F_p, C_p), jnp.bfloat16).at[:F, :C].set(Wout.astype(jnp.bfloat16))
    bout_p = jnp.zeros((1, C_p), jnp.float32).at[0, :C].set(bout)

    return dict(T0=T0, Th=Th, Wout=Wout, bout=bout,
                bn_gamma=bn_gamma, bn_beta=bn_beta,
                T0_bf=T0_bf, Th_bf=Th_bf, Wout_bf=Wout_bf, bout_p=bout_p,
                nin=nin, num_future=F, num_classes=C, num_layers=L,
                nin_pad=nin_p, f_pad=F_p, c_pad=C_p)


# ----------------------------------------------------------------------------
# Fused Pallas kernel: grid axis = layer index; per-layer streamed Th weights;
# persistent VMEM activation scratch; bf16 MXU operands, f32 elementwise.
# ----------------------------------------------------------------------------
def _make_net_kernel(*, num_steps, valid_b, valid_f, b_pad, f_pad, eps=1e-5):
    inv_count = 1.0 / float(valid_b * valid_f)
    mask_rows = valid_b != b_pad     # static: padded batch rows must be re-zeroed
    mask_cols = valid_f != f_pad     # static: belt-and-braces only (zero T cols already
                                     # re-zero padded features at the next matmul)

    def kernel(x_ref, t0_ref, th_ref, wout_ref, bout_ref, g_ref, b_ref,
               o_ref, h_ref):
        l = pl.program_id(0)

        # ---- morphic module `l`: one MXU matmul (bf16 operands, f32 accumulate) -------
        @pl.when(l == 0)
        def _():                                            # input Flat_Morphic_module
            h_ref[...] = jnp.dot(x_ref[...], t0_ref[...],
                                 preferred_element_type=jnp.float32)

        @pl.when(l > 0)
        def _():                                            # hidden Flat_Morphic_module
            h_ref[...] = jnp.dot(h_ref[...].astype(jnp.bfloat16), th_ref[0],
                                 preferred_element_type=jnp.float32)

        # ---- BatchNorm1d(1, track_running_stats=False) over the whole (B, F) slab -----
        # Invariant: padded rows/cols of the fresh pre-activation are exactly zero, so the
        # full-slab sums equal the valid-region sums; divide by the true count B*F.
        # Lane-axis partials first, then a tiny cross-sublane finish (one long XLU trip
        # per statistic instead of two full reduce-to-scalar passes).  All math in f32.
        h = h_ref[...]
        s1 = jnp.sum(h, axis=-1, keepdims=True)             # (B_p, 1)
        s2 = jnp.sum(h * h, axis=-1, keepdims=True)         # (B_p, 1)
        mean = jnp.sum(s1) * inv_count
        var = jnp.sum(s2) * inv_count - mean * mean         # biased variance (torch BN)
        inv = jax.lax.rsqrt(var + eps)
        y = jnp.tanh((h - mean) * (inv * g_ref[l]) + b_ref[l])

        # Re-zero padding so the next layer's full-slab BN sums stay exact.  Mask built
        # once per layer-step, statically dropped per axis when there is no padding, and
        # folded into the single store below (no separate rewrite pass).
        if mask_rows and mask_cols:
            m = ((jax.lax.broadcasted_iota(jnp.int32, (b_pad, f_pad), 0) < valid_b)
                 & (jax.lax.broadcasted_iota(jnp.int32, (b_pad, f_pad), 1) < valid_f))
            y = jnp.where(m, y, 0.0)
        elif mask_rows:
            m = jax.lax.broadcasted_iota(jnp.int32, (b_pad, f_pad), 0) < valid_b
            y = jnp.where(m, y, 0.0)
        elif mask_cols:
            m = jax.lax.broadcasted_iota(jnp.int32, (b_pad, f_pad), 1) < valid_f
            y = jnp.where(m, y, 0.0)
        h_ref[...] = y                                       # activation carried to next step

        # ---- final Linear on the last layer-step ---------------------------------------
        @pl.when(l == num_steps - 1)
        def _():
            o_ref[...] = (jnp.dot(y.astype(jnp.bfloat16), wout_ref[...],
                                  preferred_element_type=jnp.float32)
                          + bout_ref[...])

    return kernel


def flat_morphic_network_forward(x, params):
    """x: (B, 1, H, W) -> logits (B, num_classes)."""
    B = x.shape[0]
    nin, F, C, L = (params["nin"], params["num_future"],
                    params["num_classes"], params["num_layers"])
    nin_p, F_p, C_p = params["nin_pad"], params["f_pad"], params["c_pad"]

    # x.squeeze(dim=1) + flatten -> (B, nin); pad lane-dense and cast to bf16 for the MXU.
    x_flat = x.reshape(B, -1)
    assert x_flat.shape[1] == nin
    B_p = _round_up(B, 8)                                   # fill the 8-sublane vreg rows
    x_pad = jnp.zeros((B_p, nin_p), jnp.bfloat16).at[:B, :nin].set(
        x_flat.astype(jnp.bfloat16))

    num_steps = L + 1
    kernel = _make_net_kernel(num_steps=num_steps, valid_b=B, valid_f=F,
                              b_pad=B_p, f_pad=F_p)

    # Explicit VMEM budget: Pallas double-buffers every BlockSpec operand; Th is streamed
    # as a single (1, F_p, F_p) block so resident weights are 2*F_p^2*2B, not L*F_p^2*2B.
    # Clamp to v7x's 64 MiB physical VMEM; floor leaves headroom for compiler temporaries.
    per_buf = (B_p * nin_p * 2 + nin_p * F_p * 2 + F_p * F_p * 2
               + F_p * C_p * 2 + C_p * 4)
    vmem_needed = 2 * per_buf + 2 * (B_p * C_p * 4) + B_p * F_p * 4
    vmem_limit = int(min(max(vmem_needed + (2 << 20), 16 << 20), 64 << 20))

    out = pl.pallas_call(
        kernel,
        out_shape=jax.ShapeDtypeStruct((B_p, C_p), jnp.float32),
        grid_spec=pltpu.PrefetchScalarGridSpec(
            num_scalar_prefetch=0,
            grid=(num_steps,),                              # one step per morphic layer
            in_specs=[
                pl.BlockSpec((B_p, nin_p), lambda l: (0, 0)),      # x      (fetched once)
                pl.BlockSpec((nin_p, F_p), lambda l: (0, 0)),      # T0     (fetched once)
                pl.BlockSpec((1, F_p, F_p),                        # Th[l-1] streamed per
                             lambda l: (jnp.maximum(l - 1, 0), 0, 0)),  # step, dbl-buffered
                pl.BlockSpec((F_p, C_p), lambda l: (0, 0)),        # Wout   (fetched once)
                pl.BlockSpec((1, C_p), lambda l: (0, 0)),          # bout
                pl.BlockSpec(memory_space=pltpu.MemorySpace.SMEM), # bn gamma (scalar reads)
                pl.BlockSpec(memory_space=pltpu.MemorySpace.SMEM), # bn beta
            ],
            out_specs=pl.BlockSpec((B_p, C_p), lambda l: (0, 0)),  # written on last step
            scratch_shapes=[pltpu.VMEM((B_p, F_p), jnp.float32)],  # persistent activation
        ),
        compiler_params=pltpu.CompilerParams(
            dimension_semantics=("arbitrary",),             # layer axis is sequential
            vmem_limit_bytes=vmem_limit),
    )(x_pad, params["T0_bf"], params["Th_bf"], params["Wout_bf"], params["bout_p"],
      params["bn_gamma"], params["bn_beta"])

    return out[:B, :C]


# ----------------------------------------------------------------------------
# Pure-JAX references.
# ----------------------------------------------------------------------------
def ref_forward_matched(x, params):
    """Same numerics as the kernel (bf16 matmul operands, f32 accumulation, f32 BN/tanh,
    E[x^2]-E[x]^2 variance).  This is the correctness reference for the kernel."""
    B = x.shape[0]
    eps = 1e-5
    g, b = params["bn_gamma"], params["bn_beta"]

    def bn_tanh(z, gi, bi):
        mean = jnp.mean(z)
        var = jnp.mean(z * z) - mean * mean
        return jnp.tanh((z - mean) * jax.lax.rsqrt(var + eps) * gi + bi)

    h = x.reshape(B, -1).astype(jnp.bfloat16)
    z = jnp.dot(h, params["T0"].astype(jnp.bfloat16),
                preferred_element_type=jnp.float32)
    y = bn_tanh(z, g[0], b[0])
    for l in range(params["num_layers"]):
        z = jnp.dot(y.astype(jnp.bfloat16), params["Th"][l].astype(jnp.bfloat16),
                    preferred_element_type=jnp.float32)
        y = bn_tanh(z, g[l + 1], b[l + 1])
    return (jnp.dot(y.astype(jnp.bfloat16), params["Wout"].astype(jnp.bfloat16),
                    preferred_element_type=jnp.float32) + params["bout"])


def ref_forward_f32(x, params):
    """Full-f32 (torch-fidelity) path.  Used only to report the precision drift introduced
    by the bf16 matmul operands; expected O(1e-2) over L+2 chained matmuls."""
    B = x.shape[0]
    eps = 1e-5
    hi = jax.lax.Precision.HIGHEST
    g, b = params["bn_gamma"], params["bn_beta"]

    def bn_tanh(z, gi, bi):
        mean = jnp.mean(z)
        var = jnp.mean(z * z) - mean * mean
        return jnp.tanh((z - mean) * jax.lax.rsqrt(var + eps) * gi + bi)

    h = x.reshape(B, -1).astype(jnp.float32)
    y = bn_tanh(jnp.dot(h, params["T0"], precision=hi), g[0], b[0])
    for l in range(params["num_layers"]):
        y = bn_tanh(jnp.dot(y, params["Th"][l], precision=hi), g[l + 1], b[l + 1])
    return jnp.dot(y, params["Wout"], precision=hi) + params["bout"]


# ----------------------------------------------------------------------------
if __name__ == "__main__":
    B = 2
    H = W = 16                      # input_size=(16, 16) -> 256 flattened inputs
    num_classes = 10
    num_sinapse = 3
    window_width = 1
    num_layers = 2
    num_future = 128                # lane-dense hidden width

    key = jax.random.PRNGKey(0)
    k_x, k_p = jax.random.split(key)
    x = jax.random.normal(k_x, (B, 1, H, W), dtype=jnp.float32)

    params = init_flat_morphic_network(
        k_p, (H, W), num_classes, num_sinapse, window_width,
        num_layers, num_future)

    y = flat_morphic_network_forward(x, params)
    y = jax.block_until_ready(y)

    assert y.shape == (B, num_classes), y.shape

    # Correctness: kernel vs. numerics-matched (bf16-operand) reference.
    y_ref = ref_forward_matched(x, params)
    max_err = float(jnp.max(jnp.abs(y - y_ref)))
    assert jnp.allclose(y, y_ref, atol=2e-3, rtol=2e-3), max_err

    # Informational only: drift vs. the full-f32 torch-fidelity path from the bf16
    # matmul operands (not asserted; documented consequence of the bf16 optimization).
    _bf16_drift = float(jnp.max(jnp.abs(y - ref_forward_f32(x, params))))

    print("KERNEL_OK")
</pallas_src>

<mosaic_0001>
module attributes {stable_mosaic.version = 11 : i64} {
  func.func @kernel(%arg0: i32, %arg1: memref<8x256xbf16, #tpu.memory_space<vmem>>, %arg2: memref<256x128xbf16, #tpu.memory_space<vmem>>, %arg3: memref<1x128x128xbf16, #tpu.memory_space<vmem>>, %arg4: memref<128x128xbf16, #tpu.memory_space<vmem>>, %arg5: memref<1x128xf32, #tpu.memory_space<vmem>>, %arg6: memref<3xf32, #tpu.memory_space<smem>>, %arg7: memref<3xf32, #tpu.memory_space<smem>>, %arg8: memref<8x128xf32, #tpu.memory_space<vmem>>, %arg9: memref<8x128xf32, #tpu.memory_space<vmem>>) attributes {dimension_semantics = [#tpu.dimension_semantics<arbitrary>], iteration_bounds = array<i64: 3>, scalar_prefetch = 0 : i64, scratch_operands = 1 : i64, tpu.core_type = #tpu.core_type<tc>, window_params = [{pipeline_mode = #tpu.pipeline_mode<synchronous>, transform_indices = @transform_0, window_bounds = array<i64: 8, 256>}, {pipeline_mode = #tpu.pipeline_mode<synchronous>, transform_indices = @transform_1, window_bounds = array<i64: 256, 128>}, {transform_indices = @transform_2, window_bounds = array<i64: 1, 128, 128>}, {pipeline_mode = #tpu.pipeline_mode<synchronous>, transform_indices = @transform_3, window_bounds = array<i64: 128, 128>}, {pipeline_mode = #tpu.pipeline_mode<synchronous>, transform_indices = @transform_4, window_bounds = array<i64: 1, 128>}, {transform_indices = @transform_5, window_bounds = array<i64: 3>}, {transform_indices = @transform_6, window_bounds = array<i64: 3>}, {pipeline_mode = #tpu.pipeline_mode<synchronous>, transform_indices = @transform_7, window_bounds = array<i64: 8, 128>}]} {
    %c0_i32 = arith.constant 0 : i32
    %0 = arith.cmpi eq, %arg0, %c0_i32 : i32
    %1 = arith.extui %0 : i1 to i32
    %c0_i32_0 = arith.constant 0 : i32
    %2 = arith.cmpi ne, %1, %c0_i32_0 : i32
    scf.if %2 {
      %c0_15 = arith.constant 0 : index
      %c0_16 = arith.constant 0 : index
      %47 = vector.load %arg1[%c0_15, %c0_16] : memref<8x256xbf16, #tpu.memory_space<vmem>>, vector<8x256xbf16>
      %c0_17 = arith.constant 0 : index
      %c0_18 = arith.constant 0 : index
      %48 = vector.load %arg2[%c0_17, %c0_18] : memref<256x128xbf16, #tpu.memory_space<vmem>>, vector<256x128xbf16>
      %cst_19 = arith.constant dense<0.000000e+00> : vector<8x128xf32>
      %49 = tpu.matmul %47, %48, %cst_19 {dimension_numbers = #tpu.dot_dimension_numbers<[1], [0], [0], [1], [0, 0, 1, 1], [], []>} : vector<8x256xbf16>, vector<256x128xbf16>, vector<8x128xf32> -> vector<8x128xf32>
      %c0_20 = arith.constant 0 : index
      %c0_21 = arith.constant 0 : index
      %50 = vector.load %arg9[%c0_20, %c0_21] : memref<8x128xf32, #tpu.memory_space<vmem>>, vector<8x128xf32>
      tpu.vector_store %arg9[%c0_20, %c0_21], %49 {strides = array<i32>} : memref<8x128xf32, #tpu.memory_space<vmem>>, vector<8x128xf32>,
    } else {
    }
    %c0_i32_1 = arith.constant 0 : i32
    %3 = arith.cmpi sgt, %arg0, %c0_i32_1 : i32
    %4 = arith.extui %3 : i1 to i32
    %c0_i32_2 = arith.constant 0 : i32
    %5 = arith.cmpi ne, %4, %c0_i32_2 : i32
    scf.if %5 {
      %c0_15 = arith.constant 0 : index
      %c0_16 = arith.constant 0 : index
      %47 = vector.load %arg9[%c0_15, %c0_16] : memref<8x128xf32, #tpu.memory_space<vmem>>, vector<8x128xf32>
      %48 = arith.truncf %47 : vector<8x128xf32> to vector<8x128xbf16>
      %c0_17 = arith.constant 0 : index
      %c0_18 = arith.constant 0 : index
      %c0_19 = arith.constant 0 : index
      %49 = vector.load %arg3[%c0_17, %c0_18, %c0_19] : memref<1x128x128xbf16, #tpu.memory_space<vmem>>, vector<1x128x128xbf16>
      %50 = vector.shape_cast %49 : vector<1x128x128xbf16> to vector<128x128xbf16>
      %cst_20 = arith.constant dense<0.000000e+00> : vector<8x128xf32>
      %51 = tpu.matmul %48, %50, %cst_20 {dimension_numbers = #tpu.dot_dimension_numbers<[1], [0], [0], [1], [0, 0, 1, 1], [], []>} : vector<8x128xbf16>, vector<128x128xbf16>, vector<8x128xf32> -> vector<8x128xf32>
      %c0_21 = arith.constant 0 : index
      %c0_22 = arith.constant 0 : index
      %52 = vector.load %arg9[%c0_21, %c0_22] : memref<8x128xf32, #tpu.memory_space<vmem>>, vector<8x128xf32>
      tpu.vector_store %arg9[%c0_21, %c0_22], %51 {strides = array<i32>} : memref<8x128xf32, #tpu.memory_space<vmem>>, vector<8x128xf32>,
    } else {
    }
    %c0 = arith.constant 0 : index
    %c0_3 = arith.constant 0 : index
    %6 = vector.load %arg9[%c0, %c0_3] : memref<8x128xf32, #tpu.memory_space<vmem>>, vector<8x128xf32>
    %cst = arith.constant dense<0.000000e+00> : vector<8xf32>
    %7 = vector.multi_reduction <add>, %6, %cst [1] : vector<8x128xf32> to vector<8xf32>
    %8 = vector.shape_cast %7 : vector<8xf32> to vector<8x1xf32>
    %9 = arith.mulf %6, %6 : vector<8x128xf32>
    %cst_4 = arith.constant dense<0.000000e+00> : vector<8xf32>
    %10 = vector.multi_reduction <add>, %9, %cst_4 [1] : vector<8x128xf32> to vector<8xf32>
    %11 = vector.shape_cast %10 : vector<8xf32> to vector<8x1xf32>
    %12 = vector.shape_cast %8 : vector<8x1xf32> to vector<1x8x1xf32>
    %cst_5 = arith.constant dense<0.000000e+00> : vector<1xf32>
    %13 = vector.multi_reduction <add>, %12, %cst_5 [1, 2] : vector<1x8x1xf32> to vector<1xf32>
    %14 = vector.shape_cast %13 : vector<1xf32> to vector<1x1x1xf32>
    %15 = vector.extract %14[0, 0, 0] : f32 from vector<1x1x1xf32>
    %cst_6 = arith.constant 3.906250e-03 : f32
    %16 = arith.mulf %15, %cst_6 : f32
    %17 = vector.shape_cast %11 : vector<8x1xf32> to vector<1x8x1xf32>
    %cst_7 = arith.constant dense<0.000000e+00> : vector<1xf32>
    %18 = vector.multi_reduction <add>, %17, %cst_7 [1, 2] : vector<1x8x1xf32> to vector<1xf32>
    %19 = vector.shape_cast %18 : vector<1xf32> to vector<1x1x1xf32>
    %20 = vector.extract %19[0, 0, 0] : f32 from vector<1x1x1xf32>
    %cst_8 = arith.constant 3.906250e-03 : f32
    %21 = arith.mulf %20, %cst_8 : f32
    %22 = arith.mulf %16, %16 : f32
    %23 = arith.subf %21, %22 : f32
    %cst_9 = arith.constant 9.99999974E-6 : f32
    %24 = arith.addf %23, %cst_9 : f32
    %25 = math.rsqrt %24 : f32
    %26 = vector.broadcast %16 : f32 to vector<8x128xf32>
    %27 = arith.subf %6, %26 : vector<8x128xf32>
    %28 = arith.index_cast %arg0 : i32 to index
    %29 = memref.load %arg6[%28] : memref<3xf32, #tpu.memory_space<smem>>
    %30 = arith.mulf %25, %29 : f32
    %31 = vector.broadcast %30 : f32 to vector<8x128xf32>
    %32 = arith.mulf %27, %31 : vector<8x128xf32>
    %33 = arith.index_cast %arg0 : i32 to index
    %34 = memref.load %arg7[%33] : memref<3xf32, #tpu.memory_space<smem>>
    %35 = vector.broadcast %34 : f32 to vector<8x128xf32>
    %36 = arith.addf %32, %35 : vector<8x128xf32>
    %37 = math.tanh %36 : vector<8x128xf32>
    %38 = tpu.iota {dimensions = array<i32: 0>} : vector<8x128xi32>
    %c2_i32 = arith.constant 2 : i32
    %39 = vector.broadcast %c2_i32 : i32 to vector<8x128xi32>
    %40 = arith.cmpi slt, %38, %39 : vector<8x128xi32>
    %cst_10 = arith.constant 0.000000e+00 : f32
    %41 = vector.broadcast %cst_10 : f32 to vector<8x128xf32>
    %42 = arith.select %40, %37, %41 : vector<8x128xi1>, vector<8x128xf32>
    %c0_11 = arith.constant 0 : index
    %c0_12 = arith.constant 0 : index
    %43 = vector.load %arg9[%c0_11, %c0_12] : memref<8x128xf32, #tpu.memory_space<vmem>>, vector<8x128xf32>
    tpu.vector_store %arg9[%c0_11, %c0_12], %42 {strides = array<i32>} : memref<8x128xf32, #tpu.memory_space<vmem>>, vector<8x128xf32>,
    %c2_i32_13 = arith.constant 2 : i32
    %44 = arith.cmpi eq, %arg0, %c2_i32_13 : i32
    %45 = arith.extui %44 : i1 to i32
    %c0_i32_14 = arith.constant 0 : i32
    %46 = arith.cmpi ne, %45, %c0_i32_14 : i32
    scf.if %46 {
      %47 = arith.truncf %42 : vector<8x128xf32> to vector<8x128xbf16>
      %c0_15 = arith.constant 0 : index
      %c0_16 = arith.constant 0 : index
      %48 = vector.load %arg4[%c0_15, %c0_16] : memref<128x128xbf16, #tpu.memory_space<vmem>>, vector<128x128xbf16>
      %cst_17 = arith.constant dense<0.000000e+00> : vector<8x128xf32>
      %49 = tpu.matmul %47, %48, %cst_17 {dimension_numbers = #tpu.dot_dimension_numbers<[1], [0], [0], [1], [0, 0, 1, 1], [], []>} : vector<8x128xbf16>, vector<128x128xbf16>, vector<8x128xf32> -> vector<8x128xf32>
      %c0_18 = arith.constant 0 : index
      %c0_19 = arith.constant 0 : index
      %50 = vector.load %arg5[%c0_18, %c0_19] : memref<1x128xf32, #tpu.memory_space<vmem>>, vector<1x128xf32>
      %51 = vector.broadcast %50 : vector<1x128xf32> to vector<8x128xf32>
      %52 = arith.addf %49, %51 : vector<8x128xf32>
      %c0_20 = arith.constant 0 : index
      %c0_21 = arith.constant 0 : index
      %53 = vector.load %arg8[%c0_20, %c0_21] : memref<8x128xf32, #tpu.memory_space<vmem>>, vector<8x128xf32>
      tpu.vector_store %arg8[%c0_20, %c0_21], %52 {strides = array<i32>} : memref<8x128xf32, #tpu.memory_space<vmem>>, vector<8x128xf32>,
    } else {
    }
    return
  }
  func.func @transform_0(%arg0: i32) -> (i32, i32) {
    %c0_i32 = arith.constant 0 : i32
    %c0_i32_0 = arith.constant 0 : i32
    %c0_i32_1 = arith.constant 0 : i32
    return %c0_i32, %c0_i32_0 : i32, i32
  }
  func.func @transform_1(%arg0: i32) -> (i32, i32) {
    %c0_i32 = arith.constant 0 : i32
    %c0_i32_0 = arith.constant 0 : i32
    %c0_i32_1 = arith.constant 0 : i32
    return %c0_i32, %c0_i32_0 : i32, i32
  }
  func.func @transform_2(%arg0: i32) -> (i32, i32, i32) {
    %c1_i32 = arith.constant 1 : i32
    %0 = arith.subi %arg0, %c1_i32 : i32
    %c0_i32 = arith.constant 0 : i32
    %1 = arith.maxsi %0, %c0_i32 : i32
    %c0_i32_0 = arith.constant 0 : i32
    %c0_i32_1 = arith.constant 0 : i32
    %c0_i32_2 = arith.constant 0 : i32
    return %1, %c0_i32_0, %c0_i32_1 : i32, i32, i32
  }
  func.func @transform_3(%arg0: i32) -> (i32, i32) {
    %c0_i32 = arith.constant 0 : i32
    %c0_i32_0 = arith.constant 0 : i32
    %c0_i32_1 = arith.constant 0 : i32
    return %c0_i32, %c0_i32_0 : i32, i32
  }
  func.func @transform_4(%arg0: i32) -> (i32, i32) {
    %c0_i32 = arith.constant 0 : i32
    %c0_i32_0 = arith.constant 0 : i32
    %c0_i32_1 = arith.constant 0 : i32
    return %c0_i32, %c0_i32_0 : i32, i32
  }
  func.func @transform_5(%arg0: i32) -> i32 {
    %c0_i32 = arith.constant 0 : i32
    %c0_i32_0 = arith.constant 0 : i32
    return %c0_i32 : i32
  }
  func.func @transform_6(%arg0: i32) -> i32 {
    %c0_i32 = arith.constant 0 : i32
    %c0_i32_0 = arith.constant 0 : i32
    return %c0_i32 : i32
  }
  func.func @transform_7(%arg0: i32) -> (i32, i32) {
    %c0_i32 = arith.constant 0 : i32
    %c0_i32_0 = arith.constant 0 : i32
    %c0_i32_1 = arith.constant 0 : i32
    return %c0_i32, %c0_i32_0 : i32, i32
  }
}

</mosaic_0001>

<bundles_post_ra>
// kernel: tpu_custom_call.1
= control target key start
LH: loop header
LB: loop body
LE: loop exit
PB: predicated region body
PF: predicated region fallthrough
CT: control target
= control target key end

     0   :  { %s1785_s0 = inlined_call_operand.hbm [shape: bf16[8,256], index: 0, kind: input, shape index: {}]   ;;  %s1786_s1 = inlined_call_operand.hbm [shape: bf16[256,128], index: 1, kind: input, shape index: {}]   ;;  %s1787_s2 = inlined_call_operand.hbm [shape: bf16[2,128,128], index: 2, kind: input, shape index: {}]   ;;  %s1788_s3 = inlined_call_operand.hbm [shape: bf16[128,128], index: 3, kind: input, shape index: {}]   ;;  %s1789_s4 = inlined_call_operand.vmem [shape: f32[1,128], index: 4, kind: input, shape index: {}]   ;;  %s1790_s5 = inlined_call_operand.vmem [shape: f32[3], index: 5, kind: input, shape index: {}]   ;;  %s1791_s6 = inlined_call_operand.vmem [shape: f32[3], index: 6, kind: input, shape index: {}]   ;;  %s1792_s7 = inlined_call_operand.hbm [shape: f32[8,128], index: 7, kind: output, shape index: {}]  }
   0x1   :  { %1796 = sst [smem:[#allocation22_spill]] %s1785_s0 }
   0x2   :  { %12 = vsyncpa [#allocation4], 0 }
   0x3   :  { %13 = vsyncpa [#allocation8], 0 }
   0x4   :  { %14 = vsyncpa [#allocation6], 0 }
   0x5   :  { %15 = vsyncpa [#allocation13], 0 }
   0x6   :  { %16 = vsyncpa [#allocation5], 0  ;;  %s1507_s24 = smov 0   ;;  %s1509_s25 = smov 0  }
   0x7   :  { %s1511_s26 = smov 0   ;;  %s1513_s27 = smov 0  }
   0x8 LB: > { %s1526_s28 = sadd.s32 4294967295, %s1452_s27   ;;  %p90_p0 = scmp.ne.s32.totalorder %s1444_s25, %s1440_s24  ;;  %s1452_s27 = sphi %s1513_s27, %s1819_s27   ;;  %s1448_s26 = sphi %s1511_s26, %s1818_s26   ;;  %s1444_s25 = sphi %s1509_s25, %s1817_s25   ;;  %s1440_s24 = sphi %s1507_s24, %s1816_s24  }
   0x9   : > { %p1793_p1 = scmp.eq.s32.totalorder %s1526_s28, 0  ;;  %p933_p2 = scmp.ge.s32.totalorder %s1452_s27, 1 }
   0xa   : > { %p206_p3 = scmp.lt.s32.totalorder %s1452_s27, 4  ;;  %s1454_s8 = smov [#allocation3]  }
   0xb   : > { %p1535_p5 = por %p1793_p1, %p90_p0  ;;  %s219_s9 = sshll.u32 %s1454_s8, 4  ;;  %s220_s9 = int_to_ptr.vmem [resolvable:$true] %s219_s9 }
   0xc   : > { %p1539_p6 = pnand %p933_p2, %p206_p3  ;;  %s1455_s10 = smov [#allocation7]  }
   0xd   : > { %s1797_s29 = scalar_select %p1535_p5, 1, 0 }
   0xe   : > { %s1798_s30 = scalar_select %p1539_p6, 1, 0 }
   0xf   : > { %p1109_p7 = pneg %p1539_p6  ;;  %s229_s11 = sshll.u32 %s1455_s10, 4  ;;  %s1551_s11 = int_to_ptr.vmem [resolvable:$true] %s229_s11 }
  0x10   : > { %s1456_s13 = smov [#allocation10]   ;;  %s1800_s0 = sld [smem:[#allocation22_spill]] }
  0x11   : > { %p1547_p8 = pnand %p1109_p7, %p1793_p1  ;;  %s1553_s14 = sshll.u32 %s1456_s13, 4  ;;  %s243_s14 = int_to_ptr.vmem [resolvable:$true] %s1553_s14 }
  0x13   : > { %p1563_p10 = pneg %p1547_p8 }
  0x16   : > { %s1224_s17 = scalar_lea.hbm %s1800_s0, 128 }
  0x17   : > { %p1225_p9 = scmp.ne.s32.totalorder %s1800_s0, %s1224_s17  ;;  %p1231_p13 = scmp.lt.u32.totalorder %s1224_s17, %s1800_s0 }
  0x19   : > { %p1227_p11 = pnand %p1563_p10, %p1225_p9 }
  0x1b   : > { %p1228_p12 = pneg %p1227_p11 }
  0x1d   : > { %p1233_p0 = pnand %p1231_p13, %p1228_p12 }
  0x1f   : > { %1236 = shalt.err (!%p1233_p0)
}
  0x20   : > { %s1237_s23 = scalar_lea.vmem %s220_s9, 128  ;;  %p1245_p4 = scmp.lt.s32.totalorder %s220_s9, %s220_s9 }
  0x21   : > { %p1238_p2 = scmp.ne.s32.totalorder %s220_s9, %s1237_s23  ;;  %p1246_p1 = scmp.lt.s32.totalorder %s1237_s23, %s1237_s23 }
  0x23   : > { %p1240_p3 = pnand %p1238_p2, %p1563_p10  ;;  %p1247_p5 = por %p1246_p1, %p1245_p4 }
  0x25   : > { %p1241_p7 = pneg %p1240_p3 }
  0x27   : > { %p1248_p6 = pnand %p1247_p5, %p1241_p7 }
  0x29   : > { %1251 = shalt.err (!%p1248_p6)
}
  0x2a   : > { %1112 = dma.hbm_to_vmem [thread:$0]  (!%p1547_p8), %s1800_s0, 128, %s220_s9, [#allocation4]  }
  0x2b   : > { %s1252_s15 = scalar_lea.hbm %s1786_s1, 2048 }
  0x2c   : > { %p1253_p9 = scmp.ne.s32.totalorder %s1786_s1, %s1252_s15  ;;  %p1259_p4 = scmp.lt.u32.totalorder %s1252_s15, %s1786_s1 }
  0x2e   : > { %p1255_p11 = pnand %p1253_p9, %p1563_p10 }
  0x30   : > { %p1256_p1 = pneg %p1255_p11 }
  0x32   : > { %p1261_p5 = pnand %p1259_p4, %p1256_p1 }
  0x34   : > { %1264 = shalt.err (!%p1261_p5)
}
  0x35   : > { %s1265_s9 = scalar_lea.vmem %s1551_s11, 2048  ;;  %p1273_p0 = scmp.lt.s32.totalorder %s1551_s11, %s1551_s11 }
  0x36   : > { %p1266_p6 = scmp.ne.s32.totalorder %s1551_s11, %s1265_s9  ;;  %p1274_p2 = scmp.lt.s32.totalorder %s1265_s9, %s1265_s9 }
  0x38   : > { %p1268_p12 = pnand %p1266_p6, %p1563_p10  ;;  %p1275_p3 = por %p1274_p2, %p1273_p0 }
  0x3a   : > { %p1269_p13 = pneg %p1268_p12 }
  0x3c   : > { %p1276_p7 = pnand %p1275_p3, %p1269_p13 }
  0x3e   : > { %1279 = shalt.err (!%p1276_p7)
}
  0x3f   : > { %s1457_s21 = smov 64   ;;  %s1458_s22 = smov 4  }
  0x40   : > { %1115 = dma.hbm_to_vmem [thread:$0]  (!%p1547_p8), %s1786_s1, 2048, %s1551_s11, [#allocation8], %s1457_s21, %s1457_s21, %s1458_s22  }
  0x41   : > { %s259_s13 = sshll.u32 %s1790_s5, 4  ;;  %s1280_s17 = scalar_lea.hbm %s1788_s3, 1024  ;;  %s260_s13 = int_to_ptr.vmem [resolvable:$true] %s259_s13 }
  0x42   : > { %p1281_p9 = scmp.ne.s32.totalorder %s1788_s3, %s1280_s17  ;;  %p1287_p4 = scmp.lt.u32.totalorder %s1280_s17, %s1788_s3 }
  0x44   : > { %p1283_p11 = pnand %p1281_p9, %p1563_p10 }
  0x46   : > { %p1284_p1 = pneg %p1283_p11 }
  0x48   : > { %p1289_p5 = pnand %p1287_p4, %p1284_p1 }
  0x4a   : > { %1292 = shalt.err (!%p1289_p5)
}
  0x4b   : > { %s1293_s11 = scalar_lea.vmem %s243_s14, 1024  ;;  %p1301_p0 = scmp.lt.s32.totalorder %s243_s14, %s243_s14 }
  0x4c   : > { %p1294_p6 = scmp.ne.s32.totalorder %s243_s14, %s1293_s11  ;;  %p1302_p2 = scmp.lt.s32.totalorder %s1293_s11, %s1293_s11 }
  0x4e   : > { %p1296_p12 = pnand %p1294_p6, %p1563_p10  ;;  %p1303_p3 = por %p1302_p2, %p1301_p0 }
  0x50   : > { %p1297_p13 = pneg %p1296_p12 }
  0x52   : > { %p1304_p7 = pnand %p1303_p3, %p1297_p13 }
  0x54   : > { %1307 = shalt.err (!%p1304_p7)
}
  0x55   : > { %1118 = dma.hbm_to_vmem [thread:$0]  (!%p1547_p8), %s1788_s3, 1024, %s243_s14, [#allocation8], %s1457_s21, %s1457_s21, %s1458_s22  }
  0x56   : > { %s1308_s24 = scalar_lea.vmem %s260_s13, 16  ;;  %p1316_p4 = scmp.lt.s32.totalorder %s260_s13, %s260_s13 }
  0x57   : > { %p1309_p9 = scmp.ne.s32.totalorder %s260_s13, %s1308_s24  ;;  %p1317_p5 = scmp.lt.s32.totalorder %s1308_s24, %s1308_s24 }
  0x59   : > { %p1311_p11 = pnand %p1309_p9, %p1563_p10  ;;  %p1318_p6 = por %p1317_p5, %p1316_p4 }
  0x5b   : > { %p1312_p1 = pneg %p1311_p11 }
  0x5d   : > { %p1319_p12 = pnand %p1318_p6, %p1312_p1 }
  0x5f   : > { %1322 = shalt.err (!%p1319_p12)
}
  0x60   : > { %s1459_s8 = smov [#allocation11]   ;;  %s270_s14 = sshll.u32 %s1791_s6, 4  ;;  %s271_s14 = int_to_ptr.vmem [resolvable:$true] %s270_s14 }
  0x61   : > { %1121 = dma.vmem_to_smem (!%p1547_p8), %s260_s13, 16, %s1459_s8, [#allocation6]  }
  0x62   : > { %s1323_s16 = scalar_lea.vmem %s271_s14, 16  ;;  %p1331_p3 = scmp.lt.s32.totalorder %s271_s14, %s271_s14 }
  0x63   : > { %p1324_p13 = scmp.ne.s32.totalorder %s271_s14, %s1323_s16  ;;  %p1332_p7 = scmp.lt.s32.totalorder %s1323_s16, %s1323_s16 }
  0x65   : > { %p1326_p0 = pnand %p1324_p13, %p1563_p10  ;;  %p1333_p9 = por %p1332_p7, %p1331_p3 }
  0x67   : > { %p1327_p2 = pneg %p1326_p0 }
  0x69   : > { %p1334_p11 = pnand %p1333_p9, %p1327_p2 }
  0x6b   : > { %1337 = shalt.err (!%p1334_p11)
}
  0x6c   : > { %s1460_s17 = smov [#allocation12]   ;;  %s1642_s20 = sadd.s32 1, %s1452_s27  }
  0x6d   : > { %1124 = dma.vmem_to_smem (!%p1547_p8), %s271_s14, 16, %s1460_s17, [#allocation13]  }
  0x6e   : > { %p69_p10 = scmp.gt.s32.totalorder %s1526_s28, 0  ;;  %s932_s13 = sadd.s32 4294967295, %s1642_s20 }
  0x6f   : > { %p72_p1 = scmp.gt.s32.totalorder %s932_s13, 0  ;;  %s77_s18 = sadd.s32 1, %s1448_s26 }
  0x70   : > { %s70_s12 = scalar_select %p69_p10, %s1526_s28, 0 }
  0x71   : > { %s1821_s13 = smov (!%p72_p1, %s932_s13), 0  ;;  %p84_p4 = scmp.ne.s32.totalorder %s1448_s26, %s1444_s25 }
  0x72   : > { %p85_p5 = scmp.eq.s32.totalorder %s1452_s27, 0  ;;  %s74_s19 = ssub.s32 %s70_s12, %s1821_s13 }
  0x73   : > { %p1134_p6 = scmp.lt.s32.totalorder %s1452_s27, 3  ;;  %p75_p12 = scmp.eq.s32.totalorder %s74_s19, 0 }
  0x74   : > { %p86_p13 = por %p85_p5, %p84_p4  ;;  %s281_s9 = sand.u32 1, %s1452_s27  }
  0x75   : > { %s283_s11 = sand.u32 1, %s1448_s26   ;;  %s996_s24 = sshll.u32 %s70_s12, 10 }
  0x76   : > { %s1655_s0 = scalar_select %p75_p12, %s1448_s26, %s77_s18  }
  0x77   : > { %s940_s23 = sshll.u32 %s283_s11, 6  ;;  %s1660_s15 = scalar_lea.hbm %s1787_s2, %s996_s24 }
  0x78   : > { %s285_s14 = scalar_lea.vmem [#allocation9], %s940_s23  ;;  %p1664_p8 = pnand %p1134_p6, %p86_p13 }
  0x79   : > { %s295_s16 = sshll.u32 %s285_s14, 4  ;;  %s1668_s17 = scalar_lea.sflag [#allocation4], %s281_s9  ;;  %s1662_s16 = int_to_ptr.vmem [resolvable:$true] %s295_s16 }
  0x7a   : > { %s1338_s13 = scalar_lea.hbm %s1660_s15, 1024  ;;  %p1340_p2 = pneg %p1664_p8 }
  0x7b   : > { %p1339_p0 = scmp.ne.s32.totalorder %s1660_s15, %s1338_s13  ;;  %s1343_s19 = scalar_lea.hbm %s1787_s2, 2048 }
  0x7c   : > { %p1344_p9 = scmp.lt.u32.totalorder %s1660_s15, %s1787_s2  ;;  %p1345_p11 = scmp.lt.u32.totalorder %s1343_s19, %s1338_s13 }
  0x7d   : > { %p1341_p3 = pnand %p1340_p2, %p1339_p0  ;;  %p1347_p1 = scmp.lt.u32.totalorder %s1338_s13, %s1660_s15 }
  0x7e   : > { %p1346_p10 = por %p1345_p11, %p1344_p9 }
  0x7f   : > { %p1342_p7 = pneg %p1341_p3 }
  0x80   : > { %p1348_p4 = por %p1347_p1, %p1346_p10 }
  0x82   : > { %p1349_p5 = pnand %p1348_p4, %p1342_p7 }
  0x84   : > { %1352 = shalt.err (!%p1349_p5)
}
  0x85   : > { %s1353_s9 = scalar_lea.vmem %s1662_s16, 1024  ;;  %s1461_s24 = smov [#allocation9]  }
  0x86   : > { %p1354_p6 = scmp.ne.s32.totalorder %s1662_s16, %s1353_s9  ;;  %s1358_s8 = sshll.u32 %s1461_s24, 4  ;;  %s1359_s8 = int_to_ptr.vmem [resolvable:$false] %s1358_s8 }
  0x87   : > { %s1360_s10 = scalar_lea.vmem %s1359_s8, 2048  ;;  %p1361_p0 = scmp.lt.s32.totalorder %s1662_s16, %s1359_s8 }
  0x88   : > { %p1356_p12 = pnand %p1354_p6, %p1340_p2  ;;  %p1362_p3 = scmp.lt.s32.totalorder %s1360_s10, %s1353_s9 }
  0x8a   : > { %p1357_p13 = pneg %p1356_p12  ;;  %p1363_p9 = por %p1362_p3, %p1361_p0 }
  0x8c   : > { %p1364_p11 = pnand %p1363_p9, %p1357_p13 }
  0x8e   : > { %1367 = shalt.err (!%p1364_p11)
}
  0x8f   : > { %1128 = dma.hbm_to_vmem [thread:$0]  (!%p1664_p8), %s1660_s15, 1024, %s1662_s16, %s1668_s17, %s1457_s21, %s1457_s21, %s1458_s22  }
  0x90   : > { %p1803_p2 = scmp.ne.s32.totalorder %s1798_s30, 0 }
  0x91   : > { %p1804_p7 = scmp.eq.s32.totalorder (!%p1803_p2), %s1526_s28, 0 }
  0x92   : > { %307 = sbr.rel (%p1803_p2) target bundleno = 1357 (0x54d), region = 48 }
  0x99   : > { %1411 = dma.done.wait (%p1804_p7), [#allocation4], 128   ;;  %p1805_p10 = pmov %p1804_p7 }
  0x9a   : > { %p1806_p1 = pmov %p1804_p7 }
  0x9b   : > { %1413 = vsyncadd (%p1805_p10), [#allocation4], 4294967168 }
  0x9c   : > { %1415 = dma.done.wait (%p1806_p1), [#allocation8], 2048   ;;  %p1807_p4 = pmov %p1806_p1 }
  0x9d   : > { %s317_s14 = sand.u32 1, %s1526_s28   ;;  %s319_s21 = sand.u32 1, %s1444_s25  }
  0x9e   : > { %1417 = vsyncadd (%p1807_p4), [#allocation8], 4294965248  ;;  %s947_s22 = sshll.u32 %s319_s21, 6  ;;  %s318_s30 = scalar_lea.sflag [#allocation4], %s317_s14 }
  0x9f   : > { %s1711_s15 = scalar_lea.vmem [#allocation9], %s947_s22  ;;  %p1808_p8 = scmp.ne.s32.totalorder %s1797_s29, 0 }
  0xa1   : > { %1419 = dma.done.wait (%p1808_p8), %s318_s30, 1024  }
  0xa2   : > { %1421 = vsyncadd (%p1808_p8), %s318_s30, 4294966272  ;;  %p1809_p5 = pmov %p1806_p1 }
  0xa3   : > { %p1810_p6 = pmov %p1806_p1 }
  0xa4   : > { %1423 = dma.done.wait (%p1809_p5), [#allocation8], 1024  }
  0xa5   : > { %1425 = vsyncadd (%p1810_p6), [#allocation8], 4294966272  ;;  %p1811_p12 = pmov %p1806_p1 }
  0xa6   : > { %p1812_p13 = pmov %p1806_p1 }
  0xa7   : > { %1427 = dma.done.wait (%p1811_p12), [#allocation6], 16  }
  0xa8   : > { %1429 = vsyncadd (%p1812_p13), [#allocation6], 4294967280  ;;  %p1813_p0 = pmov %p1806_p1 }
  0xaa   : > { %1431 = dma.done.wait (%p1813_p0), [#allocation13], 16   ;;  %p1814_p3 = pmov %p1813_p0 }
  0xac   : > { %1433 = vsyncadd (%p1814_p3), [#allocation13], 4294967280 }
  0xad   : > { %338 = sfence }
  0xae   : > { %p1815_p9 = scmp.ne.s32.totalorder %s1526_s28, 0 }
  0xaf   : > { %v1186_v0 = vld [vmem:[#allocation7 + $0x40] sm:$0xff] (!%p1815_p9)   ;;  %v1188_v2 = vld [vmem:[#allocation7 + $0x48] sm:$0xff] (!%p1815_p9)   ;;  %v1190_v4 = vld [vmem:[#allocation7 + $0x50] sm:$0xff] (!%p1815_p9)  }
  0xb0   : > { %367 = sbr.rel (%p1815_p9) target bundleno = 424 (0x1a8), region = 76  ;;  %v1187_v1 = vld [vmem:[#allocation7] sm:$0xff] (!%p1815_p9)   ;;  %997 = vmatprep.subr.bf16.mxu0 (!%p1815_p9), %v1186_v0  ;;  %v1189_v3 = vld [vmem:[#allocation7 + $0x8] sm:$0xff] (!%p1815_p9)   ;;  %v1191_v5 = vld [vmem:[#allocation7 + $0x10] sm:$0xff] (!%p1815_p9)  }
  0xb1   : > { %998 = vmatpush3.bf16.msra.mxu0 (!%p1815_p9), %v1187_v1  ;;  %v1192_v6 = vld [vmem:[#allocation7 + $0x58] sm:$0xff] (!%p1815_p9)   ;;  %v1194_v8 = vld [vmem:[#allocation7 + $0x60] sm:$0xff] (!%p1815_p9)   ;;  %v1196_v10 = vld [vmem:[#allocation7 + $0x68] sm:$0xff] (!%p1815_p9)  }
  0xb2   : > { %999 = vmatprep.subr.bf16.mxu0 (!%p1815_p9), %v1188_v2  ;;  %v1193_v7 = vld [vmem:[#allocation7 + $0x18] sm:$0xff] (!%p1815_p9)   ;;  %v1195_v9 = vld [vmem:[#allocation7 + $0x20] sm:$0xff] (!%p1815_p9)   ;;  %v1197_v13 = vld [vmem:[#allocation7 + $0x28] sm:$0xff] (!%p1815_p9)  }
  0xb3   : > { %v368_v11 = vld [vmem:[#allocation3] sm:$0xff] (!%p1815_p9)  ;;  %v1198_v14 = vld [vmem:[#allocation7 + $0x70] sm:$0xff] (!%p1815_p9)  }
  0xb4   : > { %v953_v12 = vcombine.high (!%p1815_p9), %v368_v11, %v368_v11  ;;  %v1199_v15 = vld [vmem:[#allocation7 + $0x30] sm:$0xff] (!%p1815_p9)   ;;  %v1200_v16 = vld [vmem:[#allocation7 + $0x78] sm:$0xff] (!%p1815_p9)   ;;  %v952_v18 = vcombine.low (!%p1815_p9), %v368_v11, %v368_v11 }
  0xb5   : > { %1000 = vmatpush3.bf16.msra.mxu0 (!%p1815_p9), %v1189_v3  ;;  %v1201_v17 = vld [vmem:[#allocation7 + $0x38] sm:$0xff] (!%p1815_p9)  }
  0xb6   : > { %1001 = vmatprep.subr.bf16.mxu0 (!%p1815_p9), %v1190_v4  ;;  %536 = vmatprep.mubr.bf16.mxu0 (!%p1815_p9), %v953_v12 }
  0xb9   : > { %1002 = vmatpush3.bf16.msra.mxu0 %v1191_v5 }
  0xba   : > { %1003 = vmatprep.subr.bf16.mxu0 %v1192_v6 }
  0xbd   : > { %1004 = vmatpush3.bf16.msra.mxu0 %v1193_v7 }
  0xbe   : > { %1005 = vmatprep.subr.bf16.mxu0 %v1194_v8 }
  0xc1   : > { %1006 = vmatpush3.bf16.msra.mxu0 %v1195_v9 }
  0xc2   : > { %1007 = vmatprep.subr.bf16.mxu0 %v1196_v10 }
  0xc5   : > { %1008 = vmatpush3.bf16.msra.mxu0 %v1197_v13 }
  0xc6   : > { %1009 = vmatprep.subr.bf16.mxu0 %v1198_v14 }
  0xc9   : > { %1010 = vmatpush3.bf16.msra.mxu0 %v1199_v15 }
  0xca   : > { %1011 = vmatprep.subr.bf16.mxu0 %v1200_v16 }
  0xcd   : > { %1012 = vmatpush3.bf16.msra.mxu0 %v1201_v17 }
  0xd0   : > { %537 = vmatmul.mubr.bf16.vlgmr.msra.gmra.mrb[0].mxu0 %v952_v18 }
 0x1a3   : > { %v1013_v19 = vpop.f32.mrb[0].mxu0 }
 0x1a4   : > { %v1014_v20 = vpop.f32.mrb[1].mxu0 }
 0x1a5   : > { %v1015_v21 = vadd.f32 %v1014_v20, %v1013_v19  ;;  %v1016_v22 = vpop.f32.mrb[2].mxu0 }
 0x1a6   : > { %v1017_v23 = vpop.f32.mrb[3].mxu0 }
 0x1a7   : > { %544 = vst [vmem:[#allocation2] sm:$0xff] %v1015_v21 }
 0x1a8 PF: > { %p970_p11 = scmp.le.s32.totalorder %s1526_s28, 0 }
 0x1a9   : > { %v1204_v24 = vld [vmem:[%s1711_s15] sm:$0xff] (!%p970_p11)   ;;  %v1462_v25 = vmov (!%p970_p11), 0.0   ;;  %v1205_v26 = vld [vmem:[%s1711_s15 + $0x8] sm:$0xff] (!%p970_p11)   ;;  %vm1463_vm0 = vmmov (!%p970_p11), 0   ;;  %v1206_v27 = vld [vmem:[%s1711_s15 + $0x10] sm:$0xff] (!%p970_p11)  }
 0x1aa   : > { %548 = sbr.rel (%p970_p11) target bundleno = 673 (0x2a1), region = 80  ;;  %1037 = vmatprep.subr.bf16.mxu0 (!%p970_p11), %v1462_v25  ;;  %1053 = vmatprep.mubr.msk.bf16.mxu0 (!%p970_p11), %vm1463_vm0, %v1462_v25  ;;  %v1207_v28 = vld [vmem:[%s1711_s15 + $0x18] sm:$0xff] (!%p970_p11)   ;;  %v1208_v29 = vld [vmem:[%s1711_s15 + $0x20] sm:$0xff] (!%p970_p11)   ;;  %v1209_v30 = vld [vmem:[%s1711_s15 + $0x28] sm:$0xff] (!%p970_p11)  }
 0x1ab   : > { %1038 = vmatpush3.bf16.msra.mxu0 (!%p970_p11), %v1204_v24  ;;  %v1210_v31 = vld [vmem:[%s1711_s15 + $0x30] sm:$0xff] (!%p970_p11)   ;;  %v1211_v32 = vld [vmem:[%s1711_s15 + $0x38] sm:$0xff] (!%p970_p11)  }
 0x1ac   : > { %1039 = vmatprep.subr.bf16.mxu0 (!%p970_p11), %v1462_v25 }
 0x1ae   : > { %v549_v33 = vld [vmem:[#allocation2] sm:$0xff] (!%p970_p11) }
 0x1af   : > { %1040 = vmatpush3.bf16.msra.mxu0 (!%p970_p11), %v1205_v26  ;;  %v550_v34 = vpack.c.bf16 (!%p970_p11), %v549_v33, %v549_v33 }
 0x1b0   : > { %1041 = vmatprep.subr.bf16.mxu0 (!%p970_p11), %v1462_v25 }
 0x1b3   : > { %1042 = vmatpush3.bf16.msra.mxu0 %v1206_v27 }
 0x1b4   : > { %1043 = vmatprep.subr.bf16.mxu0 %v1462_v25 }
 0x1b7   : > { %1044 = vmatpush3.bf16.msra.mxu0 %v1207_v28 }
 0x1b8   : > { %1045 = vmatprep.subr.bf16.mxu0 %v1462_v25 }
 0x1bb   : > { %1046 = vmatpush3.bf16.msra.mxu0 %v1208_v29 }
 0x1bc   : > { %1047 = vmatprep.subr.bf16.mxu0 %v1462_v25 }
 0x1bf   : > { %1048 = vmatpush3.bf16.msra.mxu0 %v1209_v30 }
 0x1c0   : > { %1049 = vmatprep.subr.bf16.mxu0 %v1462_v25 }
 0x1c3   : > { %1050 = vmatpush3.bf16.msra.mxu0 %v1210_v31 }
 0x1c4   : > { %1051 = vmatprep.subr.bf16.mxu0 %v1462_v25 }
 0x1c7   : > { %1052 = vmatpush3.bf16.msra.mxu0 %v1211_v32 }
 0x1ca   : > { %1054 = vmatmul.mubr.bf16.vlgmr.msra.gmra.mrb[0].mxu0 %v550_v34 }
 0x29d   : > { %v649_v35 = vpop.f32.mrb[0].mxu0 }
 0x29e   : > { %655 = vst [vmem:[#allocation2] sm:$0xff] %v649_v35  ;;  %v1055_v36 = vpop.f32.mrb[1].mxu0 }
 0x29f   : > { %v652_v37 = vpop.f32.mrb[2].mxu0 }
 0x2a0   : > { %v1056_v38 = vpop.f32.mrb[3].mxu0 }
 0x2a1 PF: > { %vm662_vm1 = vcmask 7168   ;;  %s693_s19 = sld [smem:[#allocation11 + %s1526_s28]]  ;;  %v701_v3 = vlaneseq  ;;  %p979_p2 = scmp.ne.s32.totalorder %s1526_s28, 2 }
 0x2a2   : > { %s697_s11 = sld [smem:[#allocation12 + %s1526_s28]]  ;;  %v1216_v7 = vld [vmem:[#allocation10] sm:$0xff] (!%p979_p2)   ;;  %v1464_v8 = vmov (!%p979_p2), 0.0   ;;  %v1217_v9 = vld [vmem:[#allocation10 + $0x8] sm:$0xff] (!%p979_p2)   ;;  %vm1465_vm3 = vmmov (!%p979_p2), 0   ;;  %v1218_v10 = vld [vmem:[#allocation10 + $0x10] sm:$0xff] (!%p979_p2)  }
 0x2a3   : > { %v702_v4 = vshrl.u32 %v701_v3, 7  ;;  %1057 = vmatprep.subr.bf16.mxu0 (!%p979_p2), %v1464_v8  ;;  %1073 = vmatprep.mubr.msk.bf16.mxu0 (!%p979_p2), %vm1465_vm3, %v1464_v8  ;;  %v1219_v11 = vld [vmem:[#allocation10 + $0x18] sm:$0xff] (!%p979_p2)   ;;  %v1220_v12 = vld [vmem:[#allocation10 + $0x20] sm:$0xff] (!%p979_p2)   ;;  %v1221_v13 = vld [vmem:[#allocation10 + $0x28] sm:$0xff] (!%p979_p2)  }
 0x2a4   : > { %1058 = vmatpush3.bf16.msra.mxu0 (!%p979_p2), %v1216_v7  ;;  %v1222_v14 = vld [vmem:[#allocation10 + $0x30] sm:$0xff] (!%p979_p2)   ;;  %v1223_v15 = vld [vmem:[#allocation10 + $0x38] sm:$0xff] (!%p979_p2)  }
 0x2a5   : > { %v656_v39 = vld [vmem:[#allocation2] sm:$0xff]  ;;  %vm703_vm2 = vcmp.lt.s32.totalorder %v702_v4, 2  ;;  %1059 = vmatprep.subr.bf16.mxu0 (!%p979_p2), %v1464_v8 }
 0x2a6   : > { %657 = vadd.xlane.f32.xlu0 %v656_v39  ;;  %v659_v40 = vmul.f32 %v656_v39, %v656_v39  ;;  %vm989_vm4 = vmpackc.low (!%p979_p2), %vm703_vm2, %vm703_vm2  ;;  %v980_v17 = vld [vmem:[%s1789_s4] ss:$0 sm:$0xff] (!%p979_p2) }
 0x2a8   : > { %v698_v0 = vstv %s697_s11  ;;  %1060 = vmatpush3.bf16.msra.mxu0 (!%p979_p2), %v1217_v9 }
 0x2a9   : > { %1061 = vmatprep.subr.bf16.mxu0 (!%p979_p2), %v1464_v8 }
 0x2aa   : > { %660 = vadd.xlane.f32.xlu0 %v659_v40 }
 0x2ac   : > { %1062 = vmatpush3.bf16.msra.mxu0 (!%p979_p2), %v1218_v10 }
 0x2ad   : > { %1063 = vmatprep.subr.bf16.mxu0 (!%p979_p2), %v1464_v8 }
 0x2b0   : > { %1064 = vmatpush3.bf16.msra.mxu0 (!%p979_p2), %v1219_v11 }
 0x2b1   : > { %1065 = vmatprep.subr.bf16.mxu0 (!%p979_p2), %v1464_v8 }
 0x2b4   : > { %1066 = vmatpush3.bf16.msra.mxu0 (!%p979_p2), %v1220_v12 }
 0x2b5   : > { %1067 = vmatprep.subr.bf16.mxu0 (!%p979_p2), %v1464_v8 }
 0x2b8   : > { %1068 = vmatpush3.bf16.msra.mxu0 (!%p979_p2), %v1221_v13 }
 0x2b9   : > { %1069 = vmatprep.subr.bf16.mxu0 (!%p979_p2), %v1464_v8 }
 0x2bc   : > { %1070 = vmatpush3.bf16.msra.mxu0 (!%p979_p2), %v1222_v14 }
 0x2bd   : > { %1071 = vmatprep.subr.bf16.mxu0 (!%p979_p2), %v1464_v8 }
 0x2c0   : > { %1072 = vmatpush3.bf16.msra.mxu0 (!%p979_p2), %v1223_v15 }
 0x333   : > { %v658_v41 = vpop.xlane.xlu0 %657 }
 0x334   : > { %v663_v42 = vsel %vm662_vm1, %v658_v41, 0.0 }
 0x335   : > { %664 = vadd.xlane.f32.xlu1 %v663_v42 }
 0x337   : > { %v661_v43 = vpop.xlane.xlu0 %660 }
 0x338   : > { %v674_v44 = vsel %vm662_vm1, %v661_v43, 0.0 }
 0x339   : > { %675 = vadd.xlane.f32.xlu1 %v674_v44 }
 0x3c2   : > { %v665_v45 = vpop.xlane.xlu1 %664 }
 0x3c3   : > { %v666_v46 = vrot.slane %v665_v45, 4 }
 0x3c5   : > { %v667_v47 = vadd.f32 %v666_v46, %v665_v45 }
 0x3c6   : > { %v676_v48 = vpop.xlane.xlu1 %675 }
 0x3c7   : > { %v668_v49 = vrot.slane %v667_v47, 2  ;;  %v677_v50 = vrot.slane %v676_v48, 4 }
 0x3c9   : > { %v678_v51 = vadd.f32 %v677_v50, %v676_v48  ;;  %v669_v52 = vadd.f32 %v668_v49, %v667_v47 }
 0x3cb   : > { %v679_v53 = vrot.slane %v678_v51, 2  ;;  %v670_v54 = vrot.slane %v669_v52, 1 }
 0x3cd   : > { %v680_v55 = vadd.f32 %v679_v53, %v678_v51  ;;  %v671_v56 = vadd.f32 %v670_v54, %v669_v52 }
 0x3cf   : > { %1077 = vpush %v671_v56  ;;  %v681_v57 = vrot.slane %v680_v55, 1 }
 0x3d1   : > { %v682_v58 = vadd.f32 %v681_v57, %v680_v55 }
 0x3d3   : > { %1079 = vpush %v682_v58 }
 0x400   : > { %s1078_s29 = spop %1077 }
 0x401   : > { %s673_s16 = smul.f32 0.00390625, %s1078_s29 }
 0x403   : > { %s685_s27 = smul.f32 %s673_s16, %s673_s16  ;;  %v691_v61 = vstv %s673_s16 }
 0x404   : > { %s1080_s17 = spop %1079  ;;  %v692_v62 = vsub.f32 %v656_v39, %v691_v61 }
 0x405   : > { %s684_s13 = smul.f32 0.00390625, %s1080_s17 }
 0x407   : > { %s686_s18 = ssub.f32 %s684_s13, %s685_s27 }
 0x409   : > { %s687_s12 = sadd.f32 1e-05, %s686_s18 }
 0x40b   : > { %v688_v59 = vstv %s687_s12 }
 0x40c   : > { %1212 = vrsqrt.f32 %v688_v59 }
 0x416   : > { %v1213_v60 = vpop.eup %1212 }
 0x417   : > { %1081 = vpush %v1213_v60 }
 0x448   : > { %s1082_s23 = spop %1081 }
 0x449   : > { %s694_s9 = smul.f32 %s1082_s23, %s693_s19 }
 0x44b   : > { %v695_v63 = vstv %s694_s9 }
 0x44c   : > { %v696_v1 = vmul.f32 %v695_v63, %v692_v62 }
 0x44e   : > { %v699_v2 = vadd.f32 %v698_v0, %v696_v1 }
 0x450   : > { %1214 = vtanh.f32 %v699_v2 }
 0x456   : > { %709 = sbr.rel (%p979_p2) target bundleno = 1332 (0x534), region = 84 }
 0x45a   : > { %v1215_v5 = vpop.eup %1214 }
 0x45b   : > { %v704_v6 = vsel %vm703_vm2, %v1215_v5, 0.0  ;;  %v990_v16 = vpack.c.bf16 (!%p979_p2), %v1215_v5, %v1215_v5 }
 0x45c   : > { %705 = vst [vmem:[#allocation2] sm:$0xff] %v704_v6 }
 0x45d   : > { %1074 = vmatmul.mubr.msk.bf16.vlgmr.msra.gmra.mrb[0].mxu0 %vm989_vm4, %v990_v16 }
 0x530   : > { %v816_v18 = vpop.f32.mrb[0].mxu0 }
 0x531   : > { %v817_v19 = vadd.f32 %v980_v17, %v816_v18  ;;  %v1075_v20 = vpop.f32.mrb[1].mxu0 }
 0x532   : > { %v819_v21 = vpop.f32.mrb[2].mxu0 }
 0x533   : > { %822 = vst [vmem:[#allocation14] sm:$0xff] %v817_v19  ;;  %v1076_v22 = vpop.f32.mrb[3].mxu0 }
 0x534 PF: > { %p1140_p7 = scmp.eq.s32.totalorder %s1526_s28, 2  ;;  %s1466_s10 = smov [#allocation14]  }
 0x535   : > { %s830_s14 = sshll.u32 %s1466_s10, 4  ;;  %s831_s14 = int_to_ptr.vmem [resolvable:$true] %s830_s14 }
 0x536   : > { %s1368_s21 = scalar_lea.vmem %s831_s14, 128  ;;  %p1375_p8 = scmp.lt.s32.totalorder %s831_s14, %s831_s14 }
 0x537   : > { %p1369_p10 = scmp.ne.s32.totalorder %s831_s14, %s1368_s21  ;;  %p1376_p5 = scmp.lt.s32.totalorder %s1368_s21, %s1368_s21 }
 0x539   : > { %p1370_p1 = pnand %p1369_p10, %p1140_p7  ;;  %p1377_p6 = por %p1376_p5, %p1375_p8 }
 0x53b   : > { %p1371_p4 = pneg %p1370_p1 }
 0x53d   : > { %p1378_p12 = pnand %p1377_p6, %p1371_p4 }
 0x53f   : > { %1381 = shalt.err (!%p1378_p12)
}
 0x540   : > { %s1382_s15 = scalar_lea.hbm %s1792_s7, 128 }
 0x541   : > { %p1383_p13 = scmp.ne.s32.totalorder %s1792_s7, %s1382_s15  ;;  %p1388_p9 = scmp.lt.u32.totalorder %s1382_s15, %s1792_s7 }
 0x543   : > { %p1384_p0 = pnand %p1383_p13, %p1140_p7 }
 0x545   : > { %p1385_p3 = pneg %p1384_p0 }
 0x547   : > { %p1390_p11 = pnand %p1388_p9, %p1385_p3 }
 0x549   : > { %1393 = shalt.err (!%p1390_p11)
}
 0x54a   : > { %1106 = dma.vmem_to_hbm [thread:$0]  (%p1140_p7), %s831_s14, 128, %s1792_s7, [#allocation5]  }
 0x54b   : > { %1435 = dma.done.wait (%p1140_p7), [#allocation5], 128  }
 0x54c   : > { %1437 = vsyncadd (%p1140_p7), [#allocation5], 4294967168 }
 0x54d PF: > { %p19_p2 = scmp.ge.s32.totalorder %s1642_s20, 5   ;;  %s1816_s24 = smov %s1444_s25 }
 0x54e   : > { %s1817_s25 = smov %s1448_s26  ;;  %s1818_s26 = smov %s1655_s0 }
 0x54f   : > { %s1819_s27 = smov %s1642_s20  ;;  %21 = sbr.rel (!%p19_p2) target bundleno = 8 (0x8), region = 117 }
 0x556   :  { %843 = vsyncpa [#allocation4], 1 }
 0x557   :  { %845 = vsyncpa [#allocation4 + $0x1], 1 }
 0x558   :  { %846 = vsyncpa [#allocation8], 1 }
 0x559   :  { %847 = vsyncpa [#allocation5], 1 }
 0x55a   :  { %849 = vsyncpa [#allocation5 + $0x1], 1 }
 0x55b   :  { %850 = vsyncpa [#allocation6], 1 }
 0x55c   :  { %852 = vsyncpa [#allocation6 + $0x1], 1 }
 0x55d   :  { %853 = vsyncpa [#allocation13], 1 }

</bundles_post_ra>
